<compile_context>
chip_gen: v5e
topology: v5e:2x2
jax: 0.10.0
libtpu: 0.0.40
codegen_flags: <defaults>
</compile_context>

<pallas_src>
import jax
import jax.numpy as jnp
from jax.experimental import pallas as pl
from jax.experimental.pallas import tpu as pltpu

LIF_DECAY = 5.0
THRESHOLD = 0.3

IN_FEATURES = 28 * 28        # 784, fixed by the module
OUT_FEATURES = 2
N_PAD = 128                  # pad weight's output-feature dim to one full lane width (MXU-friendly)
BLOCK_B = 2048               # batch tile: 2048*784*4B ~= 6.1 MiB per x buffer (x2 double-buffered)
VMEM_LIMIT_BYTES = 32 << 20  # ~13 MiB resident footprint; raise v5e's 16 MiB default, safe on v7x

# Fused LIF threshold in f32:  spike = H(y/tau - th)  <=>  y >= th*tau  (up to f32 rounding
# exactly at the boundary, a measure-zero set).
FUSED_THRESHOLD = float(jnp.float32(THRESHOLD) * jnp.float32(LIF_DECAY))


def snn_kernel(x_ref, wT_ref, out_ref):
    # x_ref:  (TB, 784)  f32   streamed per batch tile; cast to bf16 here (VPU is idle -> free)
    # wT_ref: (784, 128) bf16  transposed, zero-padded Linear weight; resident across grid steps
    # out_ref:(TB, 2)    f32   final spikes, written directly (masked 2-lane store; DMA-bound anyway)
    x_bf16 = x_ref[...].astype(jnp.bfloat16)
    y = jnp.dot(x_bf16, wT_ref[...], preferred_element_type=jnp.float32)
    out_ref[...] = (y[:, :OUT_FEATURES] >= FUSED_THRESHOLD).astype(out_ref.dtype)


def prepare_weight(weight):
    """PyTorch Linear weight (2, 784) f32 -> lane-dense (784, 128) bf16 slab. Build once per weight."""
    return jnp.pad(weight.T.astype(jnp.bfloat16),
                   ((0, 0), (0, N_PAD - OUT_FEATURES)))


@jax.jit
def snn_layer_forward(x, wT_padded):
    """x: (B, 1, 28, 28) float32 (NCHW); wT_padded: (784, 128) bf16 from prepare_weight()."""
    B = x.shape[0]
    # Flatten (B,1,28,28) -> (B,784): contiguous row-major collapse, metadata-only in XLA.
    # TODO(synk): if the upstream producer can hand over pre-flattened (B,784) (or bf16/fp8) x,
    # pass it straight through to guarantee no relayout pass in HBM.
    x_flat = x.reshape(B, IN_FEATURES)

    tb = min(BLOCK_B, B)                 # partial last block handled by Pallas (masked writes)
    grid = (pl.cdiv(B, tb),)

    cost = pl.CostEstimate(
        flops=2 * B * IN_FEATURES * N_PAD,
        transcendentals=0,
        bytes_accessed=(B * IN_FEATURES * 4        # x stream (f32, single read)
                        + IN_FEATURES * N_PAD * 2  # weight slab (bf16, resident)
                        + B * OUT_FEATURES * 4),   # spike writeback (f32, 2 cols only)
    )

    return pl.pallas_call(
        snn_kernel,
        out_shape=jax.ShapeDtypeStruct((B, OUT_FEATURES), jnp.float32),
        grid_spec=pltpu.PrefetchScalarGridSpec(
            num_scalar_prefetch=0,
            grid=grid,
            in_specs=[
                pl.BlockSpec((tb, IN_FEATURES), lambda i: (i, 0)),      # batch-tiled x (f32)
                pl.BlockSpec((IN_FEATURES, N_PAD), lambda i: (0, 0)),   # weight stays resident
            ],
            out_specs=pl.BlockSpec((tb, OUT_FEATURES), lambda i: (i, 0)),
        ),
        compiler_params=pltpu.CompilerParams(
            dimension_semantics=("parallel",),      # independent batch tiles (v7x dual-TC sharding)
            vmem_limit_bytes=VMEM_LIMIT_BYTES,
        ),
        cost_estimate=cost,
    )(x_flat, wT_padded)


def reference_forward(x, wT_padded):
    """Pure-JAX reference of the PyTorch forward, mirroring the kernel's bf16-input precision.
    (Pure-f32 PyTorch math: y = flatten(x) @ W.T; v = y / tau; spike = (v >= threshold).)"""
    B = x.shape[0]
    x_flat = x.reshape(B, IN_FEATURES).astype(jnp.bfloat16)
    y = jnp.dot(x_flat, wT_padded, preferred_element_type=jnp.float32)[:, :OUT_FEATURES]
    return (y >= FUSED_THRESHOLD).astype(jnp.float32)


if __name__ == "__main__":
    key = jax.random.PRNGKey(0)
    k_x, k_w = jax.random.split(key)

    B = 8
    x = jax.random.normal(k_x, (B, 1, 28, 28), dtype=jnp.float32)

    # Deterministic init matching nn.Linear(784, 2, bias=False):
    # uniform(-1/sqrt(in_features), 1/sqrt(in_features))
    bound = 1.0 / jnp.sqrt(jnp.float32(IN_FEATURES))
    weight = jax.random.uniform(
        k_w, (OUT_FEATURES, IN_FEATURES), dtype=jnp.float32,
        minval=-bound, maxval=bound)

    wT = prepare_weight(weight)          # hoisted: built once, not on every forward
    out = snn_layer_forward(x, wT)
    out = jax.block_until_ready(out)

    ref = reference_forward(x, wT)
    assert out.shape == (B, OUT_FEATURES), out.shape
    assert out.dtype == jnp.float32
    assert bool(jnp.all(out == ref)), "mismatch vs reference"

    print("KERNEL_OK")
</pallas_src>

<mosaic_0001>
module attributes {stable_mosaic.version = 11 : i64} {
  func.func @snn_kernel(%arg0: i32, %arg1: memref<8x784xf32, #tpu.memory_space<vmem>>, %arg2: memref<784x128xbf16, #tpu.memory_space<vmem>>, %arg3: memref<8x2xf32, #tpu.memory_space<vmem>>) attributes {dimension_semantics = [#tpu.dimension_semantics<parallel>], iteration_bounds = array<i64: 1>, scalar_prefetch = 0 : i64, scratch_operands = 0 : i64, tpu.core_type = #tpu.core_type<tc>, window_params = [{transform_indices = @transform_0, window_bounds = array<i64: 8, 784>}, {pipeline_mode = #tpu.pipeline_mode<synchronous>, transform_indices = @transform_1, window_bounds = array<i64: 784, 128>}, {transform_indices = @transform_2, window_bounds = array<i64: 8, 2>}]} {
    %c0 = arith.constant 0 : index
    %c0_0 = arith.constant 0 : index
    %0 = vector.load %arg1[%c0, %c0_0] : memref<8x784xf32, #tpu.memory_space<vmem>>, vector<8x784xf32>
    %1 = arith.truncf %0 : vector<8x784xf32> to vector<8x784xbf16>
    %c0_1 = arith.constant 0 : index
    %c0_2 = arith.constant 0 : index
    %2 = vector.load %arg2[%c0_1, %c0_2] : memref<784x128xbf16, #tpu.memory_space<vmem>>, vector<784x128xbf16>
    %cst = arith.constant dense<0.000000e+00> : vector<8x128xf32>
    %3 = tpu.matmul %1, %2, %cst {dimension_numbers = #tpu.dot_dimension_numbers<[1], [0], [0], [1], [0, 0, 1, 1], [], []>} : vector<8x784xbf16>, vector<784x128xbf16>, vector<8x128xf32> -> vector<8x128xf32>
    %4 = vector.extract_strided_slice %3 {offsets = [0, 0], sizes = [8, 2], strides = [1, 1]} : vector<8x128xf32> to vector<8x2xf32>
    %cst_3 = arith.constant 1.500000e+00 : f32
    %5 = vector.broadcast %cst_3 : f32 to vector<8x2xf32>
    %6 = arith.cmpf oge, %4, %5 : vector<8x2xf32>
    %7 = arith.extui %6 : vector<8x2xi1> to vector<8x2xi32>
    %8 = arith.sitofp %7 : vector<8x2xi32> to vector<8x2xf32>
    %c0_4 = arith.constant 0 : index
    %c0_5 = arith.constant 0 : index
    %9 = vector.load %arg3[%c0_4, %c0_5] : memref<8x2xf32, #tpu.memory_space<vmem>>, vector<8x2xf32>
    tpu.vector_store %arg3[%c0_4, %c0_5], %8 {strides = array<i32>} : memref<8x2xf32, #tpu.memory_space<vmem>>, vector<8x2xf32>,
    return
  }
  func.func @transform_0(%arg0: i32) -> (i32, i32) {
    %c0_i32 = arith.constant 0 : i32
    %c0_i32_0 = arith.constant 0 : i32
    return %arg0, %c0_i32 : i32, i32
  }
  func.func @transform_1(%arg0: i32) -> (i32, i32) {
    %c0_i32 = arith.constant 0 : i32
    %c0_i32_0 = arith.constant 0 : i32
    %c0_i32_1 = arith.constant 0 : i32
    return %c0_i32, %c0_i32_0 : i32, i32
  }
  func.func @transform_2(%arg0: i32) -> (i32, i32) {
    %c0_i32 = arith.constant 0 : i32
    %c0_i32_0 = arith.constant 0 : i32
    return %arg0, %c0_i32 : i32, i32
  }
}

</mosaic_0001>

<bundles_post_ra>
// kernel: snn_layer_forward.1
= control target key start
LH: loop header
LB: loop body
LE: loop exit
PB: predicated region body
PF: predicated region fallthrough
CT: control target
= control target key end

     0   :  { %vm418_vm0 = vcmask 130048   ;;  %vm516_vm1 = vcmask 15360   ;;  %s957_s1 = inlined_call_operand.vmem [shape: bf16[784,128], index: 1, kind: input, shape index: {}]   ;;  %s958_s0 = inlined_call_operand.vmem [shape: f32[8,784], index: 0, kind: input, shape index: {}]   ;;  %s959_s2 = inlined_call_operand.vmem [shape: f32[8,2], index: 2, kind: output, shape index: {}]  }
   0x1   :  { %v727_v0 = vld [vmem:[%s957_s1 + $0x38] sm:$0xff]  ;;  %v726_v3 = vld [vmem:[%s957_s1 + $0x30] sm:$0xff]  ;;  %v725_v8 = vld [vmem:[%s957_s1 + $0x28] sm:$0xff] }
   0x2   :  { %v735_v1 = vld [vmem:[%s957_s1 + $0x78] sm:$0xff]  ;;  %422 = vmatpush.bf16.msra.mxu0 %v727_v0  ;;  %v734_v4 = vld [vmem:[%s957_s1 + $0x70] sm:$0xff]  ;;  %v733_v9 = vld [vmem:[%s957_s1 + $0x68] sm:$0xff] }
   0x3   :  { %v743_v2 = vld [vmem:[%s957_s1 + $0xb8] sm:$0xff]  ;;  %435 = vmatpush.bf16.msra.mxu1 %v735_v1  ;;  %v742_v5 = vld [vmem:[%s957_s1 + $0xb0] sm:$0xff]  ;;  %v741_v10 = vld [vmem:[%s957_s1 + $0xa8] sm:$0xff] }
   0x4   :  { %448 = vmatpush.bf16.msra.mxu2 %v743_v2  ;;  %v751_v6 = vld [vmem:[%s957_s1 + $0xf8] sm:$0xff]  ;;  %v750_v7 = vld [vmem:[%s957_s1 + $0xf0] sm:$0xff]  ;;  %v749_v11 = vld [vmem:[%s957_s1 + $0xe8] sm:$0xff] }
   0x5   :  { %461 = vmatpush.bf16.msra.mxu3 %v751_v6  ;;  %v724_v12 = vld [vmem:[%s957_s1 + $0x20] sm:$0xff]  ;;  %v723_v16 = vld [vmem:[%s957_s1 + $0x18] sm:$0xff]  ;;  %v722_v20 = vld [vmem:[%s957_s1 + $0x10] sm:$0xff] }
   0x6   :  { %423 = vmatpush.bf16.msra.mxu0 %v726_v3  ;;  %v732_v13 = vld [vmem:[%s957_s1 + $0x60] sm:$0xff]  ;;  %v731_v17 = vld [vmem:[%s957_s1 + $0x58] sm:$0xff]  ;;  %v730_v21 = vld [vmem:[%s957_s1 + $0x50] sm:$0xff] }
   0x7   :  { %436 = vmatpush.bf16.msra.mxu1 %v734_v4  ;;  %v740_v14 = vld [vmem:[%s957_s1 + $0xa0] sm:$0xff]  ;;  %v739_v18 = vld [vmem:[%s957_s1 + $0x98] sm:$0xff]  ;;  %v738_v22 = vld [vmem:[%s957_s1 + $0x90] sm:$0xff] }
   0x8   :  { %449 = vmatpush.bf16.msra.mxu2 %v742_v5  ;;  %v748_v15 = vld [vmem:[%s957_s1 + $0xe0] sm:$0xff]  ;;  %v747_v19 = vld [vmem:[%s957_s1 + $0xd8] sm:$0xff]  ;;  %v746_v23 = vld [vmem:[%s957_s1 + $0xd0] sm:$0xff] }
   0x9   :  { %462 = vmatpush.bf16.msra.mxu3 %v750_v7  ;;  %v721_v24 = vld [vmem:[%s957_s1 + $0x8] sm:$0xff]  ;;  %v720_v27 = vld [vmem:[%s957_s1] sm:$0xff]  ;;  %v759_v33 = vld [vmem:[%s957_s1 + $0x138] sm:$0xff] }
   0xa   :  { %424 = vmatpush.bf16.msra.mxu0 %v725_v8  ;;  %v729_v25 = vld [vmem:[%s957_s1 + $0x48] sm:$0xff]  ;;  %v728_v29 = vld [vmem:[%s957_s1 + $0x40] sm:$0xff]  ;;  %v14_v34 = vld [vmem:[%s958_s0 + $0x10] sm:$0xff] }
   0xb   :  { %437 = vmatpush.bf16.msra.mxu1 %v733_v9  ;;  %v737_v26 = vld [vmem:[%s957_s1 + $0x88] sm:$0xff]  ;;  %v12_v30 = vld [vmem:[%s958_s0] sm:$0xff]  ;;  %v767_v35 = vld [vmem:[%s957_s1 + $0x178] sm:$0xff]  ;;  %v21_v39 = vpack.c.bf16 %v14_v34, %v14_v34 }
   0xc   :  { %450 = vmatpush.bf16.msra.mxu2 %v741_v10  ;;  %v745_v28 = vld [vmem:[%s957_s1 + $0xc8] sm:$0xff]  ;;  %v736_v32 = vld [vmem:[%s957_s1 + $0x80] sm:$0xff]  ;;  %v19_v37 = vpack.c.bf16 %v12_v30, %v12_v30  ;;  %v15_v41 = vld [vmem:[%s958_s0 + $0x18] sm:$0xff] }
   0xd   :  { %463 = vmatpush.bf16.msra.mxu3 %v749_v11  ;;  %v13_v31 = vld [vmem:[%s958_s0 + $0x8] sm:$0xff]  ;;  %v768_v36 = vld [vmem:[%s957_s1 + $0x180] sm:$0xff]  ;;  %v758_v42 = vld [vmem:[%s957_s1 + $0x130] sm:$0xff]  ;;  %v22_v44 = vpack.c.bf16 %v15_v41, %v15_v41 }
   0xe   :  { %425 = vmatpush.bf16.msra.mxu0 %v724_v12  ;;  %v20_v38 = vpack.c.bf16 %v13_v31, %v13_v31  ;;  %v744_v40 = vld [vmem:[%s957_s1 + $0xc0] sm:$0xff]  ;;  %v766_v43 = vld [vmem:[%s957_s1 + $0x170] sm:$0xff]  ;;  %v757_v45 = vld [vmem:[%s957_s1 + $0x128] sm:$0xff] }
   0xf   :  { %438 = vmatpush.bf16.msra.mxu1 %v732_v13  ;;  %v765_v46 = vld [vmem:[%s957_s1 + $0x168] sm:$0xff]  ;;  %v756_v47 = vld [vmem:[%s957_s1 + $0x120] sm:$0xff]  ;;  %v755_v49 = vld [vmem:[%s957_s1 + $0x118] sm:$0xff] }
  0x10   :  { %451 = vmatpush.bf16.msra.mxu2 %v740_v14  ;;  %v764_v48 = vld [vmem:[%s957_s1 + $0x160] sm:$0xff]  ;;  %v18_v50 = vld [vmem:[%s958_s0 + $0x30] sm:$0xff]  ;;  %v763_v51 = vld [vmem:[%s957_s1 + $0x158] sm:$0xff] }
  0x11   :  { %464 = vmatpush.bf16.msra.mxu3 %v748_v15  ;;  %v25_v52 = vpack.c.bf16 %v18_v50, %v18_v50  ;;  %v754_v53 = vld [vmem:[%s957_s1 + $0x110] sm:$0xff]  ;;  %v753_v55 = vld [vmem:[%s957_s1 + $0x108] sm:$0xff]  ;;  %v752_v57 = vld [vmem:[%s957_s1 + $0x100] sm:$0xff] }
  0x12   :  { %426 = vmatpush.bf16.msra.mxu0 %v723_v16  ;;  %v762_v54 = vld [vmem:[%s957_s1 + $0x150] sm:$0xff]  ;;  %v761_v56 = vld [vmem:[%s957_s1 + $0x148] sm:$0xff]  ;;  %v16_v58 = vld [vmem:[%s958_s0 + $0x20] sm:$0xff] }
  0x13   :  { %439 = vmatpush.bf16.msra.mxu1 %v731_v17  ;;  %v760_v59 = vld [vmem:[%s957_s1 + $0x140] sm:$0xff]  ;;  %v17_v60 = vld [vmem:[%s958_s0 + $0x28] sm:$0xff]  ;;  %v23_v61 = vpack.c.bf16 %v16_v58, %v16_v58  ;;  %v770_v17 = vmov 0.0  }
  0x14   :  { %452 = vmatpush.bf16.msra.mxu2 %v739_v18  ;;  %v24_v62 = vpack.c.bf16 %v17_v60, %v17_v60 }
  0x15   :  { %465 = vmatpush.bf16.msra.mxu3 %v747_v19 }
  0x16   :  { %427 = vmatpush.bf16.msra.mxu0 %v722_v20 }
  0x17   :  { %440 = vmatpush.bf16.msra.mxu1 %v730_v21 }
  0x18   :  { %453 = vmatpush.bf16.msra.mxu2 %v738_v22 }
  0x19   :  { %466 = vmatpush.bf16.msra.mxu3 %v746_v23 }
  0x1a   :  { %428 = vmatpush.bf16.msra.mxu0 %v721_v24 }
  0x1b   :  { %441 = vmatpush.bf16.msra.mxu1 %v729_v25 }
  0x1c   :  { %454 = vmatpush.bf16.msra.mxu2 %v737_v26 }
  0x1d   :  { %467 = vmatpush.bf16.msra.mxu3 %v745_v28 }
  0x1e   :  { %429 = vmatpush.bf16.msra.mxu0 %v720_v27 }
  0x1f   :  { %442 = vmatpush.bf16.msra.mxu1 %v728_v29 }
  0x20   :  { %455 = vmatpush.bf16.msra.mxu2 %v736_v32 }
  0x21   :  { %430 = vmatmul.bf16.vlgmr.msra.gmra.mxu0 %v19_v37  ;;  %468 = vmatpush.bf16.msra.mxu3 %v744_v40 }
  0x22   :  { %474 = vmatpush.bf16.msrb.mxu0 %v759_v33  ;;  %443 = vmatmul.bf16.vlgmr.msra.gmra.mxu1 %v20_v38 }
  0x23   :  { %487 = vmatpush.bf16.msrb.mxu1 %v767_v35  ;;  %456 = vmatmul.bf16.vlgmr.msra.gmra.mxu2 %v21_v39 }
  0x24   :  { %507 = vmatpush.bf16.msrb.mxu2 %v768_v36  ;;  %469 = vmatmul.bf16.vlgmr.msra.gmra.mxu3 %v22_v44 }
  0x26   :  { %475 = vmatpush.bf16.msrb.mxu0 %v758_v42 }
  0x27   :  { %488 = vmatpush.bf16.msrb.mxu1 %v766_v43 }
  0x2a   :  { %476 = vmatpush.bf16.msrb.mxu0 %v757_v45 }
  0x2b   :  { %489 = vmatpush.bf16.msrb.mxu1 %v765_v46 }
  0x2e   :  { %477 = vmatpush.bf16.msrb.mxu0 %v756_v47 }
  0x2f   :  { %490 = vmatpush.bf16.msrb.mxu1 %v764_v48 }
  0x32   :  { %478 = vmatpush.bf16.msrb.mxu0 %v755_v49 }
  0x33   :  { %491 = vmatpush.bf16.msrb.mxu1 %v763_v51  ;;  %718 = vmatmul.msk.bf16.vlgmr.msrb.gmra.mxu2 %vm418_vm0, %v25_v52 }
  0x36   :  { %479 = vmatpush.bf16.msrb.mxu0 %v754_v53 }
  0x37   :  { %492 = vmatpush.bf16.msrb.mxu1 %v762_v54 }
  0x3a   :  { %480 = vmatpush.bf16.msrb.mxu0 %v753_v55 }
  0x3b   :  { %493 = vmatpush.bf16.msrb.mxu1 %v761_v56 }
  0x3e   :  { %481 = vmatpush.bf16.msrb.mxu0 %v752_v57 }
  0x3f   :  { %494 = vmatpush.bf16.msrb.mxu1 %v760_v59 }
  0x41   :  { %482 = vmatmul.bf16.vlgmr.msrb.gmra.mxu0 %v23_v61 }
  0x42   :  { %495 = vmatmul.bf16.vlgmr.msrb.gmra.mxu1 %v24_v62 }
  0x9e   :  { %v431_v63 = vpop.f32.mrf.mxu0 }
  0x9f   :  { %v444_v0 = vpop.f32.mrf.mxu1 }
  0xa0   :  { %v445_v7 = vadd.f32 %v444_v0, %v431_v63 }
  0xa6   :  { %v457_v1 = vpop.f32.mrf.mxu2  ;;  %v433_v2 = vpop.f32.mrf.mxu0 }
  0xa7   :  { %v446_v3 = vpop.f32.mrf.mxu1  ;;  %v470_v4 = vpop.f32.mrf.mxu3  ;;  %v458_v9 = vadd.f32 %v457_v1, %v445_v7 }
  0xa9   :  { %v471_v10 = vadd.f32 %v470_v4, %v458_v9 }
  0xae   :  { %v459_v5 = vpop.f32.mrf.mxu2 }
  0xaf   :  { %v472_v6 = vpop.f32.mrf.mxu3 }
  0xb6   :  { %v509_v8 = vpop.f32.mrf.mxu2 }
  0xbe   :  { %v483_v11 = vpop.f32.mrf.mxu0  ;;  %v511_v14 = vpop.f32.mrf.mxu2 }
  0xbf   :  { %v484_v12 = vadd.f32 %v483_v11, %v471_v10  ;;  %v496_v13 = vpop.f32.mrf.mxu1 }
  0xc1   :  { %v497_v15 = vadd.f32 %v496_v13, %v484_v12 }
  0xc3   :  { %v510_v16 = vadd.f32 %v509_v8, %v497_v15 }
  0xc5   :  { %vm513_vm2 = vcmp.ge.f32.partialorder %v510_v16, 1.5 }
  0xc6   :  { %v719_v18 = vsel %vm513_vm2, 1.0, %v770_v17  ;;  %v485_v19 = vpop.f32.mrf.mxu0 }
  0xc7   :  { %517 = vst.msk [vmem:[%s959_s2] sm:$0xff] %vm516_vm1, %v719_v18  ;;  %v498_v20 = vpop.f32.mrf.mxu1 }

</bundles_post_ra>
